<compile_context>
chip_gen: v7x
topology: tpu7x:2x2x1
jax: 0.10.0
libtpu: 0.0.40
codegen_flags: <defaults>
</compile_context>

<pallas_src>
import functools

import jax
import jax.numpy as jnp
from jax.experimental import pallas as pl
from jax.experimental.pallas import tpu as pltpu

EPS = 1e-4
_MAX_TM = 8192          # rows per tile; beyond this the HBM roofline is flat


def _cdiv(a, b):
    return -(-a // b)


def _hw_shards():
    """Use a 2-way shard axis only on parts with 2 TensorCores per kernel (v7x)."""
    try:
        kind = jax.devices()[0].device_kind.lower()
    except Exception:
        return 1
    return 2 if "v7" in kind else 1


def _vmem_budget_and_limit():
    """(working-set budget, vmem_limit_bytes) sized from the chip's VMEM."""
    try:
        cap = int(pltpu.get_tpu_info().vmem_capacity_bytes)
    except Exception:
        cap = 64 * 1024 * 1024              # conservative (v7x per-core)
    if cap >= 100 * 1024 * 1024:            # 128 MiB parts: v5e / v6e
        return 48 * 1024 * 1024, 96 * 1024 * 1024
    return 16 * 1024 * 1024, 32 * 1024 * 1024


def _focal_loss_kernel(l_ref, t_ref, out_ref, acc_ref, *,
                       tiles_per_shard, last_tile, rows_in_last,
                       ragged, has_overrange):
    s = pl.program_id(0)      # shard ("parallel": split across TCs on v7x)
    j = pl.program_id(1)      # row tile within shard ("arbitrary": reduction)

    @pl.when(j == 0)
    def _init():
        acc_ref[...] = jnp.zeros_like(acc_ref)

    l = l_ref[...].astype(jnp.float32)
    t = t_ref[...]

    # where(t>=0.5, sigmoid(l), 1-sigmoid(l)) == sigmoid(where(t>=0.5, l, -l));
    # the compare runs in the targets' native dtype (no upcast in the hot loop).
    z = jnp.where(t >= 0.5, l, -l)
    # sigmoid(z) = 0.5*tanh(0.5*z) + 0.5 : one EUP push, no exp+divide path.
    p = 0.5 * jnp.tanh(0.5 * z) + 0.5
    pc = jnp.clip(p, EPS, 1.0 - EPS)     # clamp feeds ONLY the log (torch semantics);
    q = 1.0 - p                          # focal factor uses the unclamped p
    loss = (-jnp.log(pc)) * (q * q)      # gamma == 2: two VPU muls, no float pow

    if not (ragged or has_overrange):
        acc_ref[...] += loss             # common fast path: every tile fully valid
    else:
        tile_idx = s * tiles_per_shard + j

        @pl.when(tile_idx < last_tile)
        def _interior():                 # interior tiles: plain VPU add, no mask
            acc_ref[...] += loss

        @pl.when(tile_idx == last_tile)
        def _last():
            if ragged:                   # only the single last tile pays for the mask
                rows = jax.lax.broadcasted_iota(jnp.int32, loss.shape, 0)
                acc_ref[...] += jnp.where(rows < rows_in_last, loss, 0.0)
            else:
                acc_ref[...] += loss
        # tile_idx > last_tile: clamped over-range shard tile -> skip entirely.

    @pl.when(j == tiles_per_shard - 1)
    def _finalize():
        # One cross-lane/sublane reduce per shard, stored to a lane-dense slab.
        out_ref[...] = jnp.broadcast_to(jnp.sum(acc_ref[...]), out_ref.shape)


def fl_multi_loss(logits, targets, *, block_rows=None, shards=None):
    """Pallas equivalent of FLMultiLoss().forward(logits, targets) (gamma=2).

    Targets may be any numeric dtype (f32 / bf16 / int8 0-1 labels); they are
    never upcast inside the kernel, so narrow label dtypes save HBM bandwidth.
    """
    assert logits.shape == targets.shape and logits.ndim == 2
    n, c = logits.shape
    total = n * c

    # Lane-dense retiling for unaligned C: reshape the flat row-major buffer to
    # width-128 rows so every vreg lane (and accumulator column) is used.
    if c % 128 != 0 and total % 128 == 0:
        x = logits.reshape(total // 128, 128)
        t = targets.reshape(total // 128, 128)
    else:
        x, t = logits, targets           # (tm, C) blocks, C = full array dim
    r, w = x.shape

    budget, vmem_limit = _vmem_budget_and_limit()
    # Footprint per grid step, with (8,128) tile padding:
    #   2 inputs x 2 pipeline buffers x (tm, w_pad) + f32 accumulator (tm, w_pad)
    w_pad = _cdiv(w, 128) * 128
    bytes_per_row = w_pad * (2 * x.dtype.itemsize + 2 * t.dtype.itemsize + 4)
    r_pad = _cdiv(r, 8) * 8
    tm = int(budget // bytes_per_row) if block_rows is None else int(block_rows)
    tm = max(8, (min(tm, _MAX_TM, r_pad) // 8) * 8)

    num_tiles = _cdiv(r, tm)
    num_shards = min(_hw_shards() if shards is None else int(shards), num_tiles)
    tps = _cdiv(num_tiles, num_shards)          # tiles per shard
    last_tile = num_tiles - 1
    rows_in_last = r - last_tile * tm
    ragged = rows_in_last != tm
    has_overrange = num_shards * tps > num_tiles

    kernel = functools.partial(
        _focal_loss_kernel,
        tiles_per_shard=tps, last_tile=last_tile, rows_in_last=rows_in_last,
        ragged=ragged, has_overrange=has_overrange)

    if has_overrange:
        # Clamp so a shard's trailing (skipped) tiles never DMA out of bounds.
        def in_map(s, j):
            return (jnp.minimum(s * tps + j, last_tile), 0)
    else:
        def in_map(s, j):
            return (s * tps + j, 0)

    out = pl.pallas_call(
        kernel,
        out_shape=jax.ShapeDtypeStruct((num_shards * 8, 128), jnp.float32),
        grid_spec=pltpu.PrefetchScalarGridSpec(
            num_scalar_prefetch=0,
            grid=(num_shards, tps),
            in_specs=[pl.BlockSpec((tm, w), in_map),
                      pl.BlockSpec((tm, w), in_map)],
            out_specs=pl.BlockSpec((8, 128), lambda s, j: (s, 0)),
            scratch_shapes=[pltpu.VMEM((tm, w), jnp.float32)],
        ),
        compiler_params=pltpu.CompilerParams(
            dimension_semantics=("parallel", "arbitrary"),
            vmem_limit_bytes=vmem_limit,
        ),
    )(x, t)

    partials = out[::8, 0]                      # one partial sum per shard
    # loss = C * mean(per-element loss) = C * sum / (N*C) = sum / N
    return (jnp.sum(partials) / jnp.float32(n)).astype(jnp.float32)


def _reference(logits, targets, gamma=2):
    """Pure-JAX transcription of the PyTorch focal_binary_cross_entropy."""
    c = targets.shape[1]
    l = logits.reshape(-1).astype(jnp.float32)
    t = targets.reshape(-1).astype(jnp.float32)
    p = jax.nn.sigmoid(l)
    p = jnp.where(t >= 0.5, p, 1.0 - p)
    logp = -jnp.log(jnp.clip(p, EPS, 1.0 - EPS))
    loss = logp * (1.0 - p) ** gamma
    return c * jnp.mean(loss)


if __name__ == "__main__":
    key = jax.random.PRNGKey(0)
    ks = jax.random.split(key, 8)

    def check(lg, tg, **kw):
        out = jax.block_until_ready(fl_multi_loss(lg, tg, **kw))
        ref = jax.block_until_ready(_reference(lg, tg))
        assert jnp.allclose(out, ref, rtol=1e-5, atol=1e-5), (out, ref)

    # Case 1: aligned multi-label batch (C multiple of 128) -> direct tiling.
    N, C = 16, 128
    lg = jax.random.normal(ks[0], (N, C), dtype=jnp.float32) * 2.0
    tg = jax.random.bernoulli(ks[1], p=0.3, shape=(N, C)).astype(jnp.float32)
    check(lg, tg)

    # Case 2: small unaligned C with N*C % 128 == 0 -> flat lane-dense reshape.
    N2, C2 = 24, 48
    lg2 = jax.random.normal(ks[2], (N2, C2), dtype=jnp.float32) * 2.0
    tg2 = jax.random.bernoulli(ks[3], p=0.3, shape=(N2, C2)).astype(jnp.float32)
    check(lg2, tg2)

    # Case 3: fully ragged shapes (N*C not a multiple of 128) -> fallback tiling.
    N3, C3 = 37, 96
    lg3 = jax.random.normal(ks[4], (N3, C3), dtype=jnp.float32) * 2.0
    tg3 = jax.random.bernoulli(ks[5], p=0.3, shape=(N3, C3)).astype(jnp.float32)
    check(lg3, tg3)

    # Case 4: force small tiles + 2 shards to exercise multi-tile accumulation,
    # the ragged-last-tile mask, and the over-range tile skip path.
    N4, C4 = 40, 128
    lg4 = jax.random.normal(ks[6], (N4, C4), dtype=jnp.float32) * 2.0
    tg4 = jax.random.bernoulli(ks[7], p=0.3, shape=(N4, C4)).astype(jnp.float32)
    check(lg4, tg4, block_rows=16, shards=2)

    print("KERNEL_OK")
</pallas_src>

<mosaic_0001>
module attributes {stable_mosaic.version = 11 : i64} {
  func.func @_focal_loss_kernel(%arg0: i32, %arg1: i32, %arg2: memref<16x128xf32, #tpu.memory_space<vmem>>, %arg3: memref<16x128xf32, #tpu.memory_space<vmem>>, %arg4: memref<8x128xf32, #tpu.memory_space<vmem>>, %arg5: memref<16x128xf32, #tpu.memory_space<vmem>>) attributes {dimension_semantics = [#tpu.dimension_semantics<parallel>, #tpu.dimension_semantics<arbitrary>], iteration_bounds = array<i64: 1, 1>, scalar_prefetch = 0 : i64, scratch_operands = 1 : i64, tpu.core_type = #tpu.core_type<tc>, window_params = [{transform_indices = @transform_0, window_bounds = array<i64: 16, 128>}, {transform_indices = @transform_1, window_bounds = array<i64: 16, 128>}, {transform_indices = @transform_2, window_bounds = array<i64: 8, 128>}]} {
    %c0_i32 = arith.constant 0 : i32
    %0 = arith.cmpi eq, %arg1, %c0_i32 : i32
    %1 = arith.extui %0 : i1 to i32
    %c0_i32_0 = arith.constant 0 : i32
    %2 = arith.cmpi ne, %1, %c0_i32_0 : i32
    scf.if %2 {
      %cst_18 = arith.constant 0.000000e+00 : f32
      %34 = vector.broadcast %cst_18 : f32 to vector<16x128xf32>
      %c0_19 = arith.constant 0 : index
      %c0_20 = arith.constant 0 : index
      %35 = vector.load %arg5[%c0_19, %c0_20] : memref<16x128xf32, #tpu.memory_space<vmem>>, vector<16x128xf32>
      tpu.vector_store %arg5[%c0_19, %c0_20], %34 {strides = array<i32>} : memref<16x128xf32, #tpu.memory_space<vmem>>, vector<16x128xf32>,
    } else {
    }
    %c0 = arith.constant 0 : index
    %c0_1 = arith.constant 0 : index
    %3 = vector.load %arg2[%c0, %c0_1] : memref<16x128xf32, #tpu.memory_space<vmem>>, vector<16x128xf32>
    %c0_2 = arith.constant 0 : index
    %c0_3 = arith.constant 0 : index
    %4 = vector.load %arg3[%c0_2, %c0_3] : memref<16x128xf32, #tpu.memory_space<vmem>>, vector<16x128xf32>
    %cst = arith.constant 5.000000e-01 : f32
    %5 = vector.broadcast %cst : f32 to vector<16x128xf32>
    %6 = arith.cmpf oge, %4, %5 : vector<16x128xf32>
    %cst_4 = arith.constant 0.000000e+00 : f32
    %7 = vector.broadcast %cst_4 : f32 to vector<16x128xf32>
    %8 = arith.subf %7, %3 : vector<16x128xf32>
    %9 = arith.select %6, %3, %8 : vector<16x128xi1>, vector<16x128xf32>
    %cst_5 = arith.constant 5.000000e-01 : f32
    %10 = vector.broadcast %cst_5 : f32 to vector<16x128xf32>
    %11 = arith.mulf %10, %9 : vector<16x128xf32>
    %12 = math.tanh %11 : vector<16x128xf32>
    %cst_6 = arith.constant 5.000000e-01 : f32
    %13 = vector.broadcast %cst_6 : f32 to vector<16x128xf32>
    %14 = arith.mulf %13, %12 : vector<16x128xf32>
    %cst_7 = arith.constant 5.000000e-01 : f32
    %15 = vector.broadcast %cst_7 : f32 to vector<16x128xf32>
    %16 = arith.addf %14, %15 : vector<16x128xf32>
    %cst_8 = arith.constant 9.99999974E-5 : f32
    %cst_9 = arith.constant 0.999899983 : f32
    %17 = vector.broadcast %cst_8 : f32 to vector<16x128xf32>
    %18 = arith.maximumf %17, %16 : vector<16x128xf32>
    %19 = vector.broadcast %cst_9 : f32 to vector<16x128xf32>
    %20 = arith.minimumf %19, %18 : vector<16x128xf32>
    %cst_10 = arith.constant 1.000000e+00 : f32
    %21 = vector.broadcast %cst_10 : f32 to vector<16x128xf32>
    %22 = arith.subf %21, %16 : vector<16x128xf32>
    %23 = math.log %20 : vector<16x128xf32>
    %cst_11 = arith.constant 0.000000e+00 : f32
    %24 = vector.broadcast %cst_11 : f32 to vector<16x128xf32>
    %25 = arith.subf %24, %23 : vector<16x128xf32>
    %26 = arith.mulf %22, %22 : vector<16x128xf32>
    %27 = arith.mulf %25, %26 : vector<16x128xf32>
    %c0_12 = arith.constant 0 : index
    %c0_13 = arith.constant 0 : index
    %28 = vector.load %arg5[%c0_12, %c0_13] : memref<16x128xf32, #tpu.memory_space<vmem>>, vector<16x128xf32>
    %29 = arith.addf %28, %27 : vector<16x128xf32>
    %c0_14 = arith.constant 0 : index
    %c0_15 = arith.constant 0 : index
    %30 = vector.load %arg5[%c0_14, %c0_15] : memref<16x128xf32, #tpu.memory_space<vmem>>, vector<16x128xf32>
    tpu.vector_store %arg5[%c0_14, %c0_15], %29 {strides = array<i32>} : memref<16x128xf32, #tpu.memory_space<vmem>>, vector<16x128xf32>,
    %c0_i32_16 = arith.constant 0 : i32
    %31 = arith.cmpi eq, %arg1, %c0_i32_16 : i32
    %32 = arith.extui %31 : i1 to i32
    %c0_i32_17 = arith.constant 0 : i32
    %33 = arith.cmpi ne, %32, %c0_i32_17 : i32
    scf.if %33 {
      %c0_18 = arith.constant 0 : index
      %c0_19 = arith.constant 0 : index
      %34 = vector.load %arg5[%c0_18, %c0_19] : memref<16x128xf32, #tpu.memory_space<vmem>>, vector<16x128xf32>
      %35 = vector.shape_cast %34 : vector<16x128xf32> to vector<1x16x128xf32>
      %cst_20 = arith.constant dense<0.000000e+00> : vector<1xf32>
      %36 = vector.multi_reduction <add>, %35, %cst_20 [1, 2] : vector<1x16x128xf32> to vector<1xf32>
      %37 = vector.shape_cast %36 : vector<1xf32> to vector<1x1x1xf32>
      %38 = vector.extract %37[0, 0, 0] : f32 from vector<1x1x1xf32>
      %39 = vector.broadcast %38 : f32 to vector<8x128xf32>
      %c0_21 = arith.constant 0 : index
      %c0_22 = arith.constant 0 : index
      %40 = vector.load %arg4[%c0_21, %c0_22] : memref<8x128xf32, #tpu.memory_space<vmem>>, vector<8x128xf32>
      tpu.vector_store %arg4[%c0_21, %c0_22], %39 {strides = array<i32>} : memref<8x128xf32, #tpu.memory_space<vmem>>, vector<8x128xf32>,
    } else {
    }
    return
  }
  func.func @transform_0(%arg0: i32, %arg1: i32) -> (i32, i32) {
    %c1_i32 = arith.constant 1 : i32
    %0 = arith.muli %arg0, %c1_i32 : i32
    %1 = arith.addi %0, %arg1 : i32
    %c0_i32 = arith.constant 0 : i32
    %c0_i32_0 = arith.constant 0 : i32
    return %1, %c0_i32 : i32, i32
  }
  func.func @transform_1(%arg0: i32, %arg1: i32) -> (i32, i32) {
    %c1_i32 = arith.constant 1 : i32
    %0 = arith.muli %arg0, %c1_i32 : i32
    %1 = arith.addi %0, %arg1 : i32
    %c0_i32 = arith.constant 0 : i32
    %c0_i32_0 = arith.constant 0 : i32
    return %1, %c0_i32 : i32, i32
  }
  func.func @transform_2(%arg0: i32, %arg1: i32) -> (i32, i32) {
    %c0_i32 = arith.constant 0 : i32
    %c0_i32_0 = arith.constant 0 : i32
    return %arg0, %c0_i32 : i32, i32
  }
}

</mosaic_0001>

<bundles_post_ra>
// kernel: tpu_custom_call.1
= control target key start
LH: loop header
LB: loop body
LE: loop exit
PB: predicated region body
PF: predicated region fallthrough
CT: control target
= control target key end

     0   :  { %7 = vsyncpa [#allocation4], 0  ;;  %s274_s0 = inlined_call_operand.hbm [shape: f32[16,128], index: 0, kind: input, shape index: {}]   ;;  %s275_s1 = inlined_call_operand.hbm [shape: f32[16,128], index: 1, kind: input, shape index: {}]   ;;  %s276_s2 = inlined_call_operand.hbm [shape: f32[8,128], index: 2, kind: output, shape index: {}]  }
   0x1   :  { %8 = vsyncpa [#allocation7], 0 }
   0x2   :  { %9 = vsyncpa [#allocation5], 0  ;;  %s218_s9 = smov [#allocation3]   ;;  %s146_s13 = scalar_lea.hbm %s274_s0, 256 }
   0x3   :  { %s19_s10 = sshll.u32 %s218_s9, 4  ;;  %p147_p0 = scmp.ne.s32.totalorder %s274_s0, %s146_s13  ;;  %s20_s10 = int_to_ptr.vmem [resolvable:$true] %s19_s10 }
   0x4   :  { %p150_p1 = scmp.lt.u32.totalorder %s146_s13, %s274_s0 }
   0x6   :  { %p152_p2 = pnand %p150_p1, %p147_p0 }
   0x8   :  { %155 = shalt.err (!%p152_p2)
}
   0x9   :  { %s156_s18 = scalar_lea.vmem %s20_s10, 256  ;;  %p161_p4 = scmp.lt.s32.totalorder %s20_s10, %s20_s10 }
   0xa   :  { %p157_p3 = scmp.ne.s32.totalorder %s20_s10, %s156_s18  ;;  %p162_p5 = scmp.lt.s32.totalorder %s156_s18, %s156_s18 }
   0xc   :  { %p163_p6 = por %p162_p5, %p161_p4 }
   0xe   :  { %p164_p7 = pnand %p163_p6, %p157_p3 }
  0x10   :  { %167 = shalt.err (!%p164_p7)
}
  0x11   :  { %s219_s19 = smov 128   ;;  %s220_s20 = smov 8  }
  0x12   :  { %25 = dma.hbm_to_vmem [thread:$0]  %s274_s0, 256, %s20_s10, [#allocation4], %s219_s19, %s219_s19, %s220_s20  }
  0x13   :  { %s221_s23 = smov [#allocation6]   ;;  %s168_s27 = scalar_lea.hbm %s275_s1, 256 }
  0x14   :  { %s35_s24 = sshll.u32 %s221_s23, 4  ;;  %p169_p8 = scmp.ne.s32.totalorder %s275_s1, %s168_s27  ;;  %s36_s24 = int_to_ptr.vmem [resolvable:$true] %s35_s24 }
  0x15   :  { %p172_p9 = scmp.lt.u32.totalorder %s168_s27, %s275_s1 }
  0x17   :  { %p174_p10 = pnand %p172_p9, %p169_p8 }
  0x19   :  { %177 = shalt.err (!%p174_p10)
}
  0x1a   :  { %s178_s4 = scalar_lea.vmem %s36_s24, 256  ;;  %p183_p12 = scmp.lt.s32.totalorder %s36_s24, %s36_s24 }
  0x1b   :  { %p179_p11 = scmp.ne.s32.totalorder %s36_s24, %s178_s4  ;;  %p184_p13 = scmp.lt.s32.totalorder %s178_s4, %s178_s4 }
  0x1d   :  { %p185_p0 = por %p184_p13, %p183_p12 }
  0x1f   :  { %p186_p1 = pnand %p185_p0, %p179_p11 }
  0x21   :  { %189 = shalt.err (!%p186_p1)
}
  0x22   :  { %41 = dma.hbm_to_vmem [thread:$0]  %s275_s1, 256, %s36_s24, [#allocation7], %s219_s19, %s219_s19, %s220_s20  }
  0x23   :  { %212 = dma.done.wait [#allocation4], 256  }
  0x24   :  { %213 = vsyncadd [#allocation4], 4294967040 }
  0x25   :  { %214 = dma.done.wait [#allocation7], 256  }
  0x26   :  { %215 = vsyncadd [#allocation7], 4294967040  ;;  %v58_v0 = vld [vmem:[#allocation3] sm:$0xff]  ;;  %v59_v1 = vld [vmem:[#allocation3 + $0x8] sm:$0xff]  ;;  %s222_s1 = smov [#allocation8]  }
  0x27   :  { %v60_v2 = vld [vmem:[#allocation6] sm:$0xff]  ;;  %v61_v3 = vld [vmem:[#allocation6 + $0x8] sm:$0xff]  ;;  %v64_v4 = vsub.f32 0.0, %v58_v0  ;;  %v65_v5 = vsub.f32 0.0, %v59_v1  ;;  %s121_s6 = sshll.u32 %s222_s1, 4  ;;  %s122_s6 = int_to_ptr.vmem [resolvable:$true] %s121_s6 }
  0x28   :  { %vm62_vm0 = vcmp.ge.f32.partialorder %v60_v2, 0.5  ;;  %vm63_vm1 = vcmp.ge.f32.partialorder %v61_v3, 0.5  ;;  %s190_s8 = scalar_lea.vmem %s122_s6, 128  ;;  %p195_p3 = scmp.lt.s32.totalorder %s122_s6, %s122_s6 }
  0x29   :  { %v66_v6 = vsel %vm62_vm0, %v58_v0, %v64_v4  ;;  %v67_v7 = vsel %vm63_vm1, %v59_v1, %v65_v5  ;;  %p191_p2 = scmp.ne.s32.totalorder %s122_s6, %s190_s8  ;;  %p196_p4 = scmp.lt.s32.totalorder %s190_s8, %s190_s8 }
  0x2a   :  { %v68_v8 = vmul.f32 0.5, %v66_v6  ;;  %v69_v9 = vmul.f32 0.5, %v67_v7 }
  0x2b   :  { %p197_p5 = por %p196_p4, %p195_p3 }
  0x2c   :  { %138 = vtanh.f32 %v68_v8 }
  0x2d   :  { %140 = vtanh.f32 %v69_v9  ;;  %p198_p6 = pnand %p197_p5, %p191_p2 }
  0x36   :  { %v139_v10 = vpop.eup %138 }
  0x37   :  { %v141_v11 = vpop.eup %140  ;;  %v72_v12 = vmul.f32 0.5, %v139_v10 }
  0x38   :  { %v73_v13 = vmul.f32 0.5, %v141_v11 }
  0x39   :  { %v74_v14 = vadd.f32 0.5, %v72_v12 }
  0x3a   :  { %v75_v15 = vadd.f32 0.5, %v73_v13 }
  0x3b   :  { %v76_v16 = vmax.f32 %v74_v14, 0.0001  ;;  %v80_v20 = vsub.f32 1.0, %v74_v14 }
  0x3c   :  { %v77_v17 = vmax.f32 %v75_v15, 0.0001  ;;  %v81_v21 = vsub.f32 1.0, %v75_v15 }
  0x3d   :  { %v78_v18 = vmin.f32 %v76_v16, 0.9999  ;;  %v88_v25 = vmul.f32 %v80_v20, %v80_v20 }
  0x3e   :  { %v79_v19 = vmin.f32 %v77_v17, 0.9999  ;;  %v89_v27 = vmul.f32 %v81_v21, %v81_v21 }
  0x3f   :  { %142 = vlog2.f32 %v78_v18 }
  0x40   :  { %144 = vlog2.f32 %v79_v19 }
  0x49   :  { %v143_v22 = vpop.eup %142 }
  0x4a   :  { %v145_v23 = vpop.eup %144  ;;  %v83_v24 = vmul.f32 0.6931472, %v143_v22 }
  0x4b   :  { %v85_v26 = vmul.f32 0.6931472, %v145_v23 }
  0x4c   :  { %v86_v28 = vsub.f32 0.0, %v83_v24 }
  0x4d   :  { %v87_v29 = vsub.f32 0.0, %v85_v26 }
  0x4e   :  { %v90_v30 = vmul.f32 %v88_v25, %v86_v28 }
  0x4f   :  { %v91_v31 = vmul.f32 %v89_v27, %v87_v29 }
  0x51   :  { %v103_v32 = vadd.f32 %v91_v31, %v90_v30 }
  0x53   :  { %104 = vadd.xlane.f32.xlu0 %v103_v32 }
  0xe0   :  { %v105_v33 = vpop.xlane.xlu0 %104 }
  0xe1   :  { %v106_v34 = vrot.slane %v105_v33, 4 }
  0xe3   :  { %v107_v35 = vadd.f32 %v106_v34, %v105_v33 }
  0xe5   :  { %v108_v36 = vrot.slane %v107_v35, 2 }
  0xe7   :  { %v109_v37 = vadd.f32 %v108_v36, %v107_v35 }
  0xe9   :  { %v110_v38 = vrot.slane %v109_v37, 1 }
  0xeb   :  { %v111_v39 = vadd.f32 %v110_v38, %v109_v37 }
  0xed   :  { %131 = vpush %v111_v39 }
 0x11e   :  { %s132_s7 = spop %131 }
 0x11f   :  { %v113_v40 = vstv %s132_s7 }
 0x120   :  { %114 = vst [vmem:[#allocation8] sm:$0xff] %v113_v40 }
 0x121   :  { %201 = shalt.err (!%p198_p6)
}
 0x122   :  { %s202_s11 = scalar_lea.hbm %s276_s2, 128 }
 0x123   :  { %p203_p7 = scmp.ne.s32.totalorder %s276_s2, %s202_s11  ;;  %p206_p8 = scmp.lt.u32.totalorder %s202_s11, %s276_s2 }
 0x125   :  { %p208_p9 = pnand %p206_p8, %p203_p7 }
 0x127   :  { %211 = shalt.err (!%p208_p9)
}
 0x128   :  { %124 = dma.vmem_to_hbm [thread:$0]  %s122_s6, 128, %s276_s2, [#allocation5]  }
 0x129   :  { %216 = dma.done.wait [#allocation5], 128  }
 0x12a   :  { %217 = vsyncadd [#allocation5], 4294967168 }
 0x12b   :  { %128 = vsyncpa [#allocation4], 1 }
 0x12c   :  { %129 = vsyncpa [#allocation7], 1 }
 0x12d   :  { %130 = vsyncpa [#allocation5], 1 }

</bundles_post_ra>
